<compile_context>
chip_gen: v5e
topology: v5e:2x2
jax: 0.10.0
libtpu: 0.0.40
codegen_flags: <defaults>
</compile_context>

<pallas_src>
import jax
import jax.numpy as jnp
from jax.experimental import pallas as pl
from jax.experimental.pallas import tpu as pltpu


def _round_up(x, m):
    return (x + m - 1) // m * m


# ---------------------------------------------------------------------------
# Kernel
# ---------------------------------------------------------------------------
def dhc_head_kernel(x_ref, wd_ref, bd_ref, wl_ref, bl_ref, wo_ref, bo_ref,
                    out_ref):
    # stage 1: h = tanh(x @ Wd + bd)      (dropout is identity at inference)
    h = jnp.tanh(
        jnp.dot(x_ref[...], wd_ref[...], preferred_element_type=jnp.float32)
        + bd_ref[...])

    # stage 2 (fused level projections): lvl = relu(h @ [W1|W2|W3|0] + [b1|b2|b3|0])
    lvl = jnp.maximum(
        jnp.dot(h.astype(wl_ref.dtype), wl_ref[...],
                preferred_element_type=jnp.float32) + bl_ref[...],
        0.0)

    # stage 3 (fused regression heads, block matmul): single lane-dense slab
    # containing o1|o2|o3 (padded to 128 lanes -> unmasked full-vreg stores).
    out_ref[...] = (
        jnp.dot(lvl.astype(wo_ref.dtype), wo_ref[...],
                preferred_element_type=jnp.float32) + bo_ref[...]
    ).astype(out_ref.dtype)


# ---------------------------------------------------------------------------
# Wrapper
# ---------------------------------------------------------------------------
def dhc_classification_head(x, packed, *, block_b=512,
                            matmul_dtype=jnp.float32):
    """x: [B, H] float32. packed: output of pack_params()."""
    n1, n2, n3 = packed["sizes"]
    n_sum = n1 + n2 + n3
    H = packed["wd"].shape[0]
    NP = packed["wl"].shape[1]
    B = x.shape[0]

    # Batch tile: multiple of 8 sublanes, capped by block_b; pad batch to it.
    tb = min(block_b, _round_up(B, 8))
    tb = max(8, (tb // 8) * 8)
    b_pad = _round_up(B, tb)
    if b_pad != B:
        x = jnp.pad(x, ((0, b_pad - B), (0, 0)))
    x = x.astype(matmul_dtype)

    wd = packed["wd"].astype(matmul_dtype)
    wl = packed["wl"].astype(matmul_dtype)
    wo = packed["wo"].astype(matmul_dtype)
    bd, bl, bo = packed["bd"], packed["bl"], packed["bo"]

    grid = (b_pad // tb,)
    itemsize = jnp.dtype(matmul_dtype).itemsize

    # Explicit VMEM budget: resident weights + double-buffered x/out tiles.
    weight_bytes = ((wd.size + wl.size + wo.size) * itemsize
                    + (bd.size + bl.size + bo.size) * 4)
    block_bytes = 2 * tb * H * itemsize + 2 * tb * NP * 4
    vmem_limit = min(max(int(1.5 * (weight_bytes + block_bytes)), 16 << 20),
                     48 << 20)  # fits v7x's smaller VMEM as well as v5e/v6e

    cost = pl.CostEstimate(
        flops=2 * b_pad * (H * H + H * NP + NP * NP),
        transcendentals=b_pad * H,
        bytes_accessed=x.size * itemsize + weight_bytes + b_pad * NP * 4,
    )

    def _resident(arr):
        # Weight/bias: constant block index -> fetched once, stays in VMEM.
        return pl.BlockSpec(arr.shape, lambda i: (0, 0))

    out_slab = pl.pallas_call(
        dhc_head_kernel,
        out_shape=jax.ShapeDtypeStruct((b_pad, NP), jnp.float32),
        grid=grid,
        in_specs=[
            pl.BlockSpec((tb, H), lambda i: (i, 0)),   # x, tiled over batch
            _resident(wd), _resident(bd),
            _resident(wl), _resident(bl),
            _resident(wo), _resident(bo),
        ],
        out_specs=pl.BlockSpec((tb, NP), lambda i: (i, 0)),
        compiler_params=pltpu.CompilerParams(
            dimension_semantics=("parallel",),      # megacore on v7x
            vmem_limit_bytes=vmem_limit),
        cost_estimate=cost,
    )(x, wd, bd, wl, bl, wo, bo)

    # Free static slices (outside the kernel) to recover the three logit sets.
    level_1 = out_slab[:B, :n1]
    level_2 = out_slab[:B, n1:n1 + n2]
    level_3 = out_slab[:B, n1 + n2:n_sum]
    return level_1, level_2, level_3


# ---------------------------------------------------------------------------
# Parameter construction / packing
# ---------------------------------------------------------------------------
def _linear_init(key, fan_in, fan_out):
    """Deterministic uniform init (mimics torch.nn.Linear default bounds)."""
    kw, kb = jax.random.split(key)
    bound = 1.0 / jnp.sqrt(jnp.float32(fan_in))
    # stored as [in, out] so the kernel computes x @ W + b
    w = jax.random.uniform(kw, (fan_in, fan_out), jnp.float32, -bound, bound)
    b = jax.random.uniform(kb, (1, fan_out), jnp.float32, -bound, bound)
    return w, b


def init_params(key, hidden_size, num_labels_per_lvl):
    n1, n2, n3 = (num_labels_per_lvl[1], num_labels_per_lvl[2],
                  num_labels_per_lvl[3])
    keys = jax.random.split(key, 6)
    p = {}
    p["wd"], p["bd"] = _linear_init(keys[0], hidden_size, hidden_size)
    p["w1"], p["b1"] = _linear_init(keys[1], hidden_size, n1)
    p["w2"], p["b2"] = _linear_init(keys[2], hidden_size, n2)
    p["w3"], p["b3"] = _linear_init(keys[3], hidden_size, n3)
    p["wr1"], p["br1"] = _linear_init(keys[4], n1, n1)
    wr2, p["br2"] = _linear_init(keys[5], n1 + n2, n2)
    p["wr2a"], p["wr2b"] = wr2[:n1], wr2[n1:]
    wr3, p["br3"] = _linear_init(jax.random.fold_in(key, 7), n2 + n3, n3)
    p["wr3a"], p["wr3b"] = wr3[:n2], wr3[n2:]
    return p


def pack_params(p):
    """Fuse per-layer weights into the lane-dense padded slabs the kernel uses."""
    H = p["wd"].shape[0]
    n1, n2, n3 = p["w1"].shape[1], p["w2"].shape[1], p["w3"].shape[1]
    n_sum = n1 + n2 + n3
    NP = max(128, _round_up(n_sum, 128))

    wl = jnp.zeros((H, NP), jnp.float32)
    wl = wl.at[:, :n1].set(p["w1"])
    wl = wl.at[:, n1:n1 + n2].set(p["w2"])
    wl = wl.at[:, n1 + n2:n_sum].set(p["w3"])
    bl = jnp.zeros((1, NP), jnp.float32)
    bl = bl.at[:, :n1].set(p["b1"])
    bl = bl.at[:, n1:n1 + n2].set(p["b2"])
    bl = bl.at[:, n1 + n2:n_sum].set(p["b3"])

    wo = jnp.zeros((NP, NP), jnp.float32)
    wo = wo.at[:n1, :n1].set(p["wr1"])
    wo = wo.at[:n1, n1:n1 + n2].set(p["wr2a"])
    wo = wo.at[n1:n1 + n2, n1:n1 + n2].set(p["wr2b"])
    wo = wo.at[n1:n1 + n2, n1 + n2:n_sum].set(p["wr3a"])
    wo = wo.at[n1 + n2:n_sum, n1 + n2:n_sum].set(p["wr3b"])
    bo = jnp.zeros((1, NP), jnp.float32)
    bo = bo.at[:, :n1].set(p["br1"])
    bo = bo.at[:, n1:n1 + n2].set(p["br2"])
    bo = bo.at[:, n1 + n2:n_sum].set(p["br3"])

    return {"wd": p["wd"], "bd": p["bd"], "wl": wl, "bl": bl,
            "wo": wo, "bo": bo, "sizes": (n1, n2, n3)}


# ---------------------------------------------------------------------------
# Pure-JAX reference
# ---------------------------------------------------------------------------
def _reference(x, p):
    h = jnp.tanh(x @ p["wd"] + p["bd"])
    l1 = jax.nn.relu(h @ p["w1"] + p["b1"])
    l2 = jax.nn.relu(h @ p["w2"] + p["b2"])
    l3 = jax.nn.relu(h @ p["w3"] + p["b3"])
    lvl1 = l1 @ p["wr1"] + p["br1"]
    lvl2 = jnp.concatenate([l1, l2], axis=1) @ jnp.concatenate(
        [p["wr2a"], p["wr2b"]], axis=0) + p["br2"]
    lvl3 = jnp.concatenate([l2, l3], axis=1) @ jnp.concatenate(
        [p["wr3a"], p["wr3b"]], axis=0) + p["br3"]
    return lvl1, lvl2, lvl3


if __name__ == "__main__":
    key = jax.random.PRNGKey(0)
    B, H = 8, 32
    num_labels_per_lvl = {1: 8, 2: 16, 3: 24}

    k_x, k_p = jax.random.split(key)
    x = jax.random.normal(k_x, (B, H), jnp.float32)
    params = init_params(k_p, H, num_labels_per_lvl)
    packed = pack_params(params)

    r1, r2, r3 = _reference(x, params)

    # f32 matmul path (exact check against the reference).
    o1, o2, o3 = jax.block_until_ready(
        dhc_classification_head(x, packed, matmul_dtype=jnp.float32))
    assert o1.shape == (B, num_labels_per_lvl[1])
    assert o2.shape == (B, num_labels_per_lvl[2])
    assert o3.shape == (B, num_labels_per_lvl[3])
    assert jnp.allclose(o1, r1, atol=1e-4)
    assert jnp.allclose(o2, r2, atol=1e-4)
    assert jnp.allclose(o3, r3, atol=1e-4)

    # bf16 matmul operands (production path on v6e/v7x), f32 accumulation.
    b1, b2, b3 = jax.block_until_ready(
        dhc_classification_head(x, packed, matmul_dtype=jnp.bfloat16))
    assert jnp.allclose(b1, r1, atol=5e-2, rtol=5e-2)
    assert jnp.allclose(b2, r2, atol=5e-2, rtol=5e-2)
    assert jnp.allclose(b3, r3, atol=5e-2, rtol=5e-2)

    print("KERNEL_OK")
</pallas_src>

<mosaic_0001>
module attributes {stable_mosaic.version = 11 : i64} {
  func.func @dhc_head_kernel(%arg0: i32, %arg1: memref<8x32xf32, #tpu.memory_space<vmem>>, %arg2: memref<32x32xf32, #tpu.memory_space<vmem>>, %arg3: memref<1x32xf32, #tpu.memory_space<vmem>>, %arg4: memref<32x128xf32, #tpu.memory_space<vmem>>, %arg5: memref<1x128xf32, #tpu.memory_space<vmem>>, %arg6: memref<128x128xf32, #tpu.memory_space<vmem>>, %arg7: memref<1x128xf32, #tpu.memory_space<vmem>>, %arg8: memref<8x128xf32, #tpu.memory_space<vmem>>) attributes {dimension_semantics = [#tpu.dimension_semantics<parallel>], iteration_bounds = array<i64: 1>, scalar_prefetch = 0 : i64, scratch_operands = 0 : i64, tpu.core_type = #tpu.core_type<tc>, window_params = [{transform_indices = @transform_0, window_bounds = array<i64: 8, 32>}, {pipeline_mode = #tpu.pipeline_mode<synchronous>, transform_indices = @transform_1, window_bounds = array<i64: 32, 32>}, {pipeline_mode = #tpu.pipeline_mode<synchronous>, transform_indices = @transform_2, window_bounds = array<i64: 1, 32>}, {pipeline_mode = #tpu.pipeline_mode<synchronous>, transform_indices = @transform_3, window_bounds = array<i64: 32, 128>}, {pipeline_mode = #tpu.pipeline_mode<synchronous>, transform_indices = @transform_4, window_bounds = array<i64: 1, 128>}, {pipeline_mode = #tpu.pipeline_mode<synchronous>, transform_indices = @transform_5, window_bounds = array<i64: 128, 128>}, {pipeline_mode = #tpu.pipeline_mode<synchronous>, transform_indices = @transform_6, window_bounds = array<i64: 1, 128>}, {transform_indices = @transform_7, window_bounds = array<i64: 8, 128>}]} {
    %c0 = arith.constant 0 : index
    %c0_0 = arith.constant 0 : index
    %0 = vector.load %arg1[%c0, %c0_0] : memref<8x32xf32, #tpu.memory_space<vmem>>, vector<8x32xf32>
    %c0_1 = arith.constant 0 : index
    %c0_2 = arith.constant 0 : index
    %1 = vector.load %arg2[%c0_1, %c0_2] : memref<32x32xf32, #tpu.memory_space<vmem>>, vector<32x32xf32>
    %cst = arith.constant dense<0.000000e+00> : vector<8x32xf32>
    %2 = tpu.matmul %0, %1, %cst {dimension_numbers = #tpu.dot_dimension_numbers<[1], [0], [0], [1], [0, 0, 1, 1], [], []>} : vector<8x32xf32>, vector<32x32xf32>, vector<8x32xf32> -> vector<8x32xf32>
    %c0_3 = arith.constant 0 : index
    %c0_4 = arith.constant 0 : index
    %3 = vector.load %arg3[%c0_3, %c0_4] : memref<1x32xf32, #tpu.memory_space<vmem>>, vector<1x32xf32>
    %4 = vector.broadcast %3 : vector<1x32xf32> to vector<8x32xf32>
    %5 = arith.addf %2, %4 : vector<8x32xf32>
    %6 = math.tanh %5 : vector<8x32xf32>
    %c0_5 = arith.constant 0 : index
    %c0_6 = arith.constant 0 : index
    %7 = vector.load %arg4[%c0_5, %c0_6] : memref<32x128xf32, #tpu.memory_space<vmem>>, vector<32x128xf32>
    %cst_7 = arith.constant dense<0.000000e+00> : vector<8x128xf32>
    %8 = tpu.matmul %6, %7, %cst_7 {dimension_numbers = #tpu.dot_dimension_numbers<[1], [0], [0], [1], [0, 0, 1, 1], [], []>} : vector<8x32xf32>, vector<32x128xf32>, vector<8x128xf32> -> vector<8x128xf32>
    %c0_8 = arith.constant 0 : index
    %c0_9 = arith.constant 0 : index
    %9 = vector.load %arg5[%c0_8, %c0_9] : memref<1x128xf32, #tpu.memory_space<vmem>>, vector<1x128xf32>
    %10 = vector.broadcast %9 : vector<1x128xf32> to vector<8x128xf32>
    %11 = arith.addf %8, %10 : vector<8x128xf32>
    %cst_10 = arith.constant 0.000000e+00 : f32
    %12 = vector.broadcast %cst_10 : f32 to vector<8x128xf32>
    %13 = arith.maximumf %11, %12 : vector<8x128xf32>
    %c0_11 = arith.constant 0 : index
    %c0_12 = arith.constant 0 : index
    %14 = vector.load %arg6[%c0_11, %c0_12] : memref<128x128xf32, #tpu.memory_space<vmem>>, vector<128x128xf32>
    %cst_13 = arith.constant dense<0.000000e+00> : vector<8x128xf32>
    %15 = tpu.matmul %13, %14, %cst_13 {dimension_numbers = #tpu.dot_dimension_numbers<[1], [0], [0], [1], [0, 0, 1, 1], [], []>} : vector<8x128xf32>, vector<128x128xf32>, vector<8x128xf32> -> vector<8x128xf32>
    %c0_14 = arith.constant 0 : index
    %c0_15 = arith.constant 0 : index
    %16 = vector.load %arg7[%c0_14, %c0_15] : memref<1x128xf32, #tpu.memory_space<vmem>>, vector<1x128xf32>
    %17 = vector.broadcast %16 : vector<1x128xf32> to vector<8x128xf32>
    %18 = arith.addf %15, %17 : vector<8x128xf32>
    %c0_16 = arith.constant 0 : index
    %c0_17 = arith.constant 0 : index
    %19 = vector.load %arg8[%c0_16, %c0_17] : memref<8x128xf32, #tpu.memory_space<vmem>>, vector<8x128xf32>
    tpu.vector_store %arg8[%c0_16, %c0_17], %18 {strides = array<i32>} : memref<8x128xf32, #tpu.memory_space<vmem>>, vector<8x128xf32>,
    return
  }
  func.func @transform_0(%arg0: i32) -> (i32, i32) {
    %c0_i32 = arith.constant 0 : i32
    %c0_i32_0 = arith.constant 0 : i32
    return %arg0, %c0_i32 : i32, i32
  }
  func.func @transform_1(%arg0: i32) -> (i32, i32) {
    %c0_i32 = arith.constant 0 : i32
    %c0_i32_0 = arith.constant 0 : i32
    %c0_i32_1 = arith.constant 0 : i32
    return %c0_i32, %c0_i32_0 : i32, i32
  }
  func.func @transform_2(%arg0: i32) -> (i32, i32) {
    %c0_i32 = arith.constant 0 : i32
    %c0_i32_0 = arith.constant 0 : i32
    %c0_i32_1 = arith.constant 0 : i32
    return %c0_i32, %c0_i32_0 : i32, i32
  }
  func.func @transform_3(%arg0: i32) -> (i32, i32) {
    %c0_i32 = arith.constant 0 : i32
    %c0_i32_0 = arith.constant 0 : i32
    %c0_i32_1 = arith.constant 0 : i32
    return %c0_i32, %c0_i32_0 : i32, i32
  }
  func.func @transform_4(%arg0: i32) -> (i32, i32) {
    %c0_i32 = arith.constant 0 : i32
    %c0_i32_0 = arith.constant 0 : i32
    %c0_i32_1 = arith.constant 0 : i32
    return %c0_i32, %c0_i32_0 : i32, i32
  }
  func.func @transform_5(%arg0: i32) -> (i32, i32) {
    %c0_i32 = arith.constant 0 : i32
    %c0_i32_0 = arith.constant 0 : i32
    %c0_i32_1 = arith.constant 0 : i32
    return %c0_i32, %c0_i32_0 : i32, i32
  }
  func.func @transform_6(%arg0: i32) -> (i32, i32) {
    %c0_i32 = arith.constant 0 : i32
    %c0_i32_0 = arith.constant 0 : i32
    %c0_i32_1 = arith.constant 0 : i32
    return %c0_i32, %c0_i32_0 : i32, i32
  }
  func.func @transform_7(%arg0: i32) -> (i32, i32) {
    %c0_i32 = arith.constant 0 : i32
    %c0_i32_0 = arith.constant 0 : i32
    return %arg0, %c0_i32 : i32, i32
  }
}

</mosaic_0001>

<bundles_post_ra>
// kernel: tpu_custom_call.1
= control target key start
LH: loop header
LB: loop body
LE: loop exit
PB: predicated region body
PF: predicated region fallthrough
CT: control target
= control target key end

     0   :  { %12 = vsyncpa [#allocation3], 0  ;;  %s429_s0 = inlined_call_operand.hbm [shape: f32[8,32], index: 0, kind: input, shape index: {}]   ;;  %s430_s1 = inlined_call_operand.hbm [shape: f32[32,32], index: 1, kind: input, shape index: {}]   ;;  %s431_s2 = inlined_call_operand.vmem [shape: f32[1,32], index: 2, kind: input, shape index: {}]   ;;  %s432_s3 = inlined_call_operand.hbm [shape: f32[32,128], index: 3, kind: input, shape index: {}]   ;;  %s433_s4 = inlined_call_operand.vmem [shape: f32[1,128], index: 4, kind: input, shape index: {}]   ;;  %s434_s5 = inlined_call_operand.hbm [shape: f32[128,128], index: 5, kind: input, shape index: {}]   ;;  %s435_s6 = inlined_call_operand.vmem [shape: f32[1,128], index: 6, kind: input, shape index: {}]   ;;  %s436_s7 = inlined_call_operand.hbm [shape: f32[8,128], index: 7, kind: output, shape index: {}]  }
   0x1   :  { %13 = vsyncpa [#allocation6], 0 }
   0x2   :  { %14 = vsyncpa [#allocation9], 0  ;;  %s31_s26 = sshll.u32 %s430_s1, 4  ;;  %s32_s26 = int_to_ptr.hbm [resolvable:$true] %s31_s26 }
   0x3   :  { %15 = vsyncpa [#allocation4], 0  ;;  %s356_s27 = smov [#allocation5]   ;;  %s21_s8 = sshll.u32 %s429_s0, 4  ;;  %s22_s8 = int_to_ptr.hbm [resolvable:$true] %s21_s8 }
   0x4   :  { %s33_s28 = sshll.u32 %s356_s27, 4  ;;  %s357_s9 = smov 128   ;;  %s34_s28 = int_to_ptr.vmem [resolvable:$true] %s33_s28 }
   0x5   :  { %s358_s10 = smov 8   ;;  %s359_s11 = smov [#allocation2]  }
   0x6   :  { %39 = dma.hbm_to_vmem [thread:$0]  %s32_s26, 512, %s34_s28, [#allocation6], %s357_s9, %s357_s9, %s358_s10  }
   0x7   :  { %s23_s12 = sshll.u32 %s359_s11, 4  ;;  %s46_s15 = sshll.u32 %s432_s3, 4  ;;  %s24_s12 = int_to_ptr.vmem [resolvable:$true] %s23_s12  ;;  %s47_s15 = int_to_ptr.hbm [resolvable:$true] %s46_s15 }
   0x8   :  { %26 = dma.hbm_to_vmem [thread:$0]  %s22_s8, 128, %s24_s12, [#allocation3]  }
   0x9   :  { %s61_s17 = sshll.u32 %s434_s5, 4  ;;  %s360_s18 = smov [#allocation7]   ;;  %s62_s17 = int_to_ptr.hbm [resolvable:$true] %s61_s17 }
   0xa   :  { %s48_s19 = sshll.u32 %s360_s18, 4  ;;  %s361_s0 = smov [#allocation8]   ;;  %s49_s19 = int_to_ptr.vmem [resolvable:$true] %s48_s19 }
   0xb   :  { %54 = dma.hbm_to_vmem [thread:$0]  %s47_s15, 512, %s49_s19, [#allocation6], %s357_s9, %s357_s9, %s358_s10  }
   0xc   :  { %s63_s20 = sshll.u32 %s361_s0, 4  ;;  %s64_s20 = int_to_ptr.vmem [resolvable:$true] %s63_s20 }
   0xd   :  { %69 = dma.hbm_to_vmem [thread:$0]  %s62_s17, 2048, %s64_s20, [#allocation9], %s357_s9, %s357_s9, %s358_s10  }
   0xe   :  { %348 = dma.done.wait [#allocation3], 128  }
   0xf   :  { %349 = vsyncadd [#allocation3], 4294967168 }
  0x10   :  { %350 = dma.done.wait [#allocation6], 1024  }
  0x11   :  { %351 = vsyncadd [#allocation6], 4294966272 }
  0x12   :  { %352 = dma.done.wait [#allocation9], 2048  }
  0x13   :  { %353 = vsyncadd [#allocation9], 4294965248  ;;  %v92_v0 = vld [vmem:[#allocation5 + $0x18] sm:$0xff]  ;;  %v91_v1 = vld [vmem:[#allocation5 + $0x10] sm:$0xff]  ;;  %vm97_vm0 = vcmask 261120   ;;  %s362_s24 = smov [#allocation10]  }
  0x14   :  { %113 = vmatpush.msra.mxu0 %v92_v0  ;;  %v90_v2 = vld [vmem:[#allocation5 + $0x8] sm:$0xff]  ;;  %v89_v3 = vld [vmem:[#allocation5] sm:$0xff]  ;;  %v88_v4 = vld [vmem:[#allocation2] sm:$0xff]  ;;  %s200_s25 = sshll.u32 %s362_s24, 4  ;;  %s202_s28 = sshll.u32 %s436_s7, 4  ;;  %s201_s25 = int_to_ptr.vmem [resolvable:$true] %s200_s25  ;;  %s203_s28 = int_to_ptr.hbm [resolvable:$true] %s202_s28 }
  0x15   :  { %v125_v5 = vld [vmem:[#allocation7 + $0x18] sm:$0xff]  ;;  %v124_v6 = vld [vmem:[#allocation7 + $0x10] sm:$0xff]  ;;  %v123_v7 = vld [vmem:[#allocation7 + $0x8] sm:$0xff] }
  0x16   :  { %114 = vmatpush.msra.mxu0 %v91_v1  ;;  %145 = vmatpush.msra.mxu1 %v125_v5  ;;  %v122_v8 = vld [vmem:[#allocation7] sm:$0xff]  ;;  %v169_v9 = vld [vmem:[#allocation8 + $0x78] sm:$0xff]  ;;  %v168_v10 = vld [vmem:[#allocation8 + $0x70] sm:$0xff] }
  0x17   :  { %174 = vmatpush.msra.mxu2 %v169_v9  ;;  %v167_v11 = vld [vmem:[#allocation8 + $0x68] sm:$0xff]  ;;  %v166_v12 = vld [vmem:[#allocation8 + $0x60] sm:$0xff]  ;;  %v165_v13 = vld [vmem:[#allocation8 + $0x58] sm:$0xff] }
  0x18   :  { %115 = vmatpush.msra.mxu0 %v90_v2  ;;  %146 = vmatpush.msra.mxu1 %v124_v6  ;;  %v164_v14 = vld [vmem:[#allocation8 + $0x50] sm:$0xff]  ;;  %v163_v15 = vld [vmem:[#allocation8 + $0x48] sm:$0xff]  ;;  %v162_v16 = vld [vmem:[#allocation8 + $0x40] sm:$0xff] }
  0x19   :  { %175 = vmatpush.msra.mxu2 %v168_v10  ;;  %v161_v17 = vld [vmem:[#allocation8 + $0x38] sm:$0xff]  ;;  %v160_v18 = vld [vmem:[#allocation8 + $0x30] sm:$0xff]  ;;  %v159_v19 = vld [vmem:[#allocation8 + $0x28] sm:$0xff] }
  0x1a   :  { %116 = vmatpush.msra.mxu0 %v89_v3  ;;  %147 = vmatpush.msra.mxu1 %v123_v7  ;;  %v223_v20 = vld [vmem:[%s431_s2] ss:$0 sm:$0xff]  ;;  %v158_v21 = vld [vmem:[#allocation8 + $0x20] sm:$0xff]  ;;  %v156_v26 = vld [vmem:[#allocation8 + $0x10] sm:$0xff] }
  0x1b   :  { %214 = vmatmul.msk.f32.vlgmr.msra.gmra.mxu0 %vm97_vm0, %v88_v4  ;;  %176 = vmatpush.msra.mxu2 %v167_v11  ;;  %v157_v23 = vld [vmem:[#allocation8 + $0x18] sm:$0xff]  ;;  %v155_v27 = vld [vmem:[#allocation8 + $0x8] sm:$0xff]  ;;  %v154_v28 = vld [vmem:[#allocation8] sm:$0xff] }
  0x1c   :  { %148 = vmatpush.msra.mxu1 %v122_v8  ;;  %v224_v29 = vld [vmem:[%s433_s4] ss:$0 sm:$0xff] }
  0x1d   :  { %177 = vmatpush.msra.mxu2 %v166_v12  ;;  %v225_v33 = vld [vmem:[%s435_s6] ss:$0 sm:$0xff] }
  0x1f   :  { %178 = vmatpush.msra.mxu2 %v165_v13 }
  0x21   :  { %179 = vmatpush.msra.mxu2 %v164_v14 }
  0x23   :  { %180 = vmatpush.msra.mxu2 %v163_v15 }
  0x25   :  { %181 = vmatpush.msra.mxu2 %v162_v16 }
  0x27   :  { %182 = vmatpush.msra.mxu2 %v161_v17 }
  0x29   :  { %183 = vmatpush.msra.mxu2 %v160_v18 }
  0x2b   :  { %184 = vmatpush.msra.mxu2 %v159_v19 }
  0x2d   :  { %185 = vmatpush.msra.mxu2 %v158_v21 }
  0x2f   :  { %186 = vmatpush.msra.mxu2 %v157_v23 }
  0x31   :  { %187 = vmatpush.msra.mxu2 %v156_v26 }
  0x33   :  { %188 = vmatpush.msra.mxu2 %v155_v27 }
  0x35   :  { %189 = vmatpush.msra.mxu2 %v154_v28 }
  0x98   :  { %v118_v22 = vpop.f32.mrf.mxu0 }
  0x99   :  { %v119_v24 = vadd.f32 %v223_v20, %v118_v22 }
  0x9b   :  { %226 = vtanh.f32 %v119_v24 }
  0xa1   :  { %v227_v25 = vpop.eup %226 }
  0xa2   :  { %215 = vmatmul.msk.f32.vlgmr.msra.gmra.mxu1 %vm97_vm0, %v227_v25 }
 0x11f   :  { %v150_v30 = vpop.f32.mrf.mxu1 }
 0x120   :  { %v151_v31 = vadd.f32 %v224_v29, %v150_v30 }
 0x122   :  { %v153_v32 = vmax.f32 %v151_v31, 0.0 }
 0x124   :  { %190 = vmatmul.f32.vlgmr.msra.gmra.mxu2 %v153_v32 }
 0x1a7   :  { %v191_v34 = vpop.f32.mrf.mxu2 }
 0x1a8   :  { %v192_v35 = vadd.f32 %v225_v33, %v191_v34 }
 0x1aa   :  { %194 = vst [vmem:[#allocation10] sm:$0xff] %v192_v35 }
 0x1ab   :  { %205 = dma.vmem_to_hbm [thread:$0]  %s201_s25, 128, %s203_s28, [#allocation4]  }
 0x1ac   :  { %354 = dma.done.wait [#allocation4], 128  }
 0x1ad   :  { %355 = vsyncadd [#allocation4], 4294967168 }
 0x1ae   :  { %210 = vsyncpa [#allocation3], 1 }
 0x1af   :  { %211 = vsyncpa [#allocation6], 1 }
 0x1b0   :  { %212 = vsyncpa [#allocation9], 1 }
 0x1b1   :  { %213 = vsyncpa [#allocation4], 1 }

</bundles_post_ra>
